<compile_context>
chip_gen: v7x
topology: tpu7x:2x2x1
jax: 0.10.0
libtpu: 0.0.40
codegen_flags: <defaults>
</compile_context>

<pallas_src>
from functools import partial

import jax
import jax.numpy as jnp
from jax.experimental import pallas as pl
from jax.experimental.pallas import tpu as pltpu


# ---------------------------------------------------------------------------
# Fused kernel: backbone stand-in (1x1 conv + ReLU) + streaming GAP.
# grid = (B // Bt, HW // tile_hw) -> ("parallel", "arbitrary").
# NOTE: the reduction axis (spatial tiles, j) must stay the innermost grid
# dimension and the output index_map must be constant over j -- the output
# block is the GAP accumulator (init at j==0, finalize at the last j).
# ---------------------------------------------------------------------------
def _backbone_gap_kernel(x_ref, wb_ref, o_ref, *, inv_hw):
    j = pl.program_id(1)                       # spatial-tile (reduction) index

    @pl.when(j == 0)
    def _():                                   # init per-batch GAP accumulator
        o_ref[...] = jnp.zeros_like(o_ref)

    wb = wb_ref[...]                           # (F, Cin)  f32
    f, cin = wb.shape
    bt, _, tile_hw = x_ref.shape

    # Chunk the spatial tile so the (F, csz) intermediate fits in the vreg
    # file (F=64, csz=512 -> 32 vregs) even when tile_hw is large.
    csz = 512 if (tile_hw % 512 == 0) else tile_hw
    n_chunks = tile_hw // csz

    # Hoist the Cin weight columns (each (F,1)); broadcasting inside the
    # multiply keeps them lane-replicated, no per-channel cross-lane extract
    # in the hot loop.
    w_cols = [wb[:, c:c + 1] for c in range(cin)]

    for bi in range(bt):                       # static unroll, Bt <= 8
        part = jnp.zeros((f, 1), jnp.float32)
        for k in range(n_chunks):              # static chunk loop (view slices)
            c0 = k * csz
            xc = x_ref[bi, :, c0:c0 + csz]     # (Cin, csz), lanes = csz
            # 1x1 conv as Cin broadcast multiply-adds on the VPU (Cin is tiny;
            # a K=Cin MXU matmul would waste >95% of the systolic array).
            feat = w_cols[0] * xc[0:1, :]      # (F, csz), full 128-lane vregs
            for c in range(1, cin):
                feat = feat + w_cols[c] * xc[c:c + 1, :]
            feat = jnp.maximum(feat, 0.0)      # ReLU on the VPU
            # Streaming GAP partial sum: lane reduce -> XLU slot.
            part = part + jnp.sum(feat, axis=-1, keepdims=True)   # (F, 1)
        o_ref[bi] = o_ref[bi] + part

    @pl.when(j == pl.num_programs(1) - 1)
    def _():                                   # finalize GAP: sum -> mean
        o_ref[...] = o_ref[...] * inv_hw


def _pick_tile_hw(hw):
    for cand in (2048, 1024, 512, 256, 128):
        if hw % cand == 0:
            return cand
    return hw                                   # full extent (always legal)


def _pick_batch_block(b):
    # Fill the batch block (fewer grid steps, good for single-TC v5e/v6e) but
    # keep >= 2 batch blocks when possible so v7x's two TensorCores both work.
    for cand in (8, 4, 2, 1):
        if b % cand == 0 and b // cand >= 2:
            return cand
    return b                                    # b == 1


@partial(jax.jit, static_argnames=("tile_hw", "batch_block"))
def network_forward(x_nchw, backbone_w, fc_w, fc_b, tile_hw=None,
                    batch_block=None):
    """NCHW input -> (B, num_classes) logits."""
    b, cin, h, w = x_nchw.shape
    hw = h * w
    f = backbone_w.shape[0]                     # backbone_w: (F, Cin)
    nc = fc_w.shape[1]                          # fc_w: (F, nc)

    # Free view of the NCHW tensor: (B, Cin, H*W).  No transpose, no extra
    # HBM round trip.
    x_flat = x_nchw.reshape(b, cin, hw)

    if tile_hw is None:
        tile_hw = _pick_tile_hw(hw)
    assert hw % tile_hw == 0, (hw, tile_hw)
    n_tiles = hw // tile_hw

    if batch_block is None:
        batch_block = _pick_batch_block(b)
    assert b % batch_block == 0, (b, batch_block)
    bt = batch_block

    # x is read exactly once; pooled (B*F) and the conv weight are tiny.
    cost = pl.CostEstimate(
        flops=2 * b * hw * cin * f + 2 * b * hw * f,
        transcendentals=0,
        bytes_accessed=4 * (x_flat.size + b * f + backbone_w.size),
    )

    pooled = pl.pallas_call(
        partial(_backbone_gap_kernel, inv_hw=1.0 / hw),
        out_shape=jax.ShapeDtypeStruct((b, f, 1), jnp.float32),
        grid=(b // bt, n_tiles),
        in_specs=[
            pl.BlockSpec((bt, cin, tile_hw), lambda i, j: (i, 0, j)),  # x tile
            pl.BlockSpec((f, cin), lambda i, j: (0, 0)),               # conv w
        ],
        out_specs=pl.BlockSpec((bt, f, 1), lambda i, j: (i, 0, 0)),    # GAP acc
        compiler_params=pltpu.CompilerParams(
            dimension_semantics=("parallel", "arbitrary")),
        cost_estimate=cost,
    )(x_flat, backbone_w)

    pooled = pooled.reshape(b, f)               # x.view(B, -1)
    # FC classifier: tiny (B,F)x(F,nc) matmul, done once outside the kernel.
    return pooled @ fc_w + fc_b


# ---------------------------------------------------------------------------
# Network wrapper (GAP module + FC classifier, 'cifar' backbone => 64 features)
# ---------------------------------------------------------------------------
class NetworkPallas:
    def __init__(self, in_channels=3, num_features=64, num_classes=10,
                 key=jax.random.PRNGKey(42)):
        k1, k2, k3 = jax.random.split(key, 3)
        self.num_features = num_features
        self.num_classes = num_classes
        # deterministic synthetic parameters; backbone weight stored (F, Cin)
        self.backbone_w = (jax.random.normal(k1, (num_features, in_channels),
                                             jnp.float32)
                           * (1.0 / jnp.sqrt(in_channels)))
        bound = 1.0 / jnp.sqrt(num_features)
        self.fc_w = jax.random.uniform(k2, (num_features, num_classes),
                                       jnp.float32, -bound, bound)
        self.fc_b = jax.random.uniform(k3, (num_classes,),
                                       jnp.float32, -bound, bound)

    def __call__(self, x_nchw, tile_hw=None, batch_block=None):
        return network_forward(x_nchw, self.backbone_w, self.fc_w, self.fc_b,
                               tile_hw=tile_hw, batch_block=batch_block)

    # pure-JAX reference of the same forward (for verification)
    def reference(self, x_nchw):
        b, c, h, w = x_nchw.shape
        x2 = x_nchw.reshape(b, c, h * w)
        feats = jnp.maximum(jnp.einsum("fc,bcp->bfp", self.backbone_w, x2), 0.0)
        pooled = feats.mean(axis=-1)
        return pooled @ self.fc_w + self.fc_b


if __name__ == "__main__":
    key = jax.random.PRNGKey(0)
    x = jax.random.normal(key, (2, 3, 16, 16), jnp.float32)   # NCHW, like PyTorch

    net = NetworkPallas(in_channels=3, num_features=64, num_classes=10)
    # tile_hw=128 on a 16x16 input forces two reduction steps, exercising the
    # init / accumulate / finalize (pl.when) path; batch blocks = 2 x Bt=1.
    out = net(x, tile_hw=128)
    out = jax.block_until_ready(out)

    ref = net.reference(x)
    assert out.shape == (2, 10), out.shape
    assert jnp.allclose(out, ref, atol=1e-4, rtol=1e-4), "mismatch vs reference"

    # Also exercise the default (auto tile / batch-block) path once.
    out2 = jax.block_until_ready(net(x))
    assert jnp.allclose(out2, ref, atol=1e-4, rtol=1e-4), "mismatch (auto tiles)"

    print("KERNEL_OK")
</pallas_src>

<mosaic_0001>
module attributes {stable_mosaic.version = 11 : i64} {
  func.func @_backbone_gap_kernel(%arg0: i32, %arg1: i32, %arg2: memref<1x3x128xf32, #tpu.memory_space<vmem>>, %arg3: memref<64x3xf32, #tpu.memory_space<vmem>>, %arg4: memref<1x64x1xf32, #tpu.memory_space<vmem>>) attributes {dimension_semantics = [#tpu.dimension_semantics<parallel>, #tpu.dimension_semantics<arbitrary>], iteration_bounds = array<i64: 2, 2>, scalar_prefetch = 0 : i64, scratch_operands = 0 : i64, tpu.core_type = #tpu.core_type<tc>, window_params = [{transform_indices = @transform_0, window_bounds = array<i64: 1, 3, 128>}, {pipeline_mode = #tpu.pipeline_mode<synchronous>, transform_indices = @transform_1, window_bounds = array<i64: 64, 3>}, {transform_indices = @transform_2, window_bounds = array<i64: 1, 64, 1>}]} {
    %c0_i32 = arith.constant 0 : i32
    %0 = arith.cmpi eq, %arg1, %c0_i32 : i32
    %1 = arith.extui %0 : i1 to i32
    %c0_i32_0 = arith.constant 0 : i32
    %2 = arith.cmpi ne, %1, %c0_i32_0 : i32
    scf.if %2 {
      %cst_14 = arith.constant 0.000000e+00 : f32
      %38 = vector.broadcast %cst_14 : f32 to vector<1x64x1xf32>
      %c0_15 = arith.constant 0 : index
      %c0_16 = arith.constant 0 : index
      %c0_17 = arith.constant 0 : index
      %39 = vector.load %arg4[%c0_15, %c0_16, %c0_17] : memref<1x64x1xf32, #tpu.memory_space<vmem>>, vector<1x64x1xf32>
      tpu.vector_store %arg4[%c0_15, %c0_16, %c0_17], %38 {strides = array<i32>} : memref<1x64x1xf32, #tpu.memory_space<vmem>>, vector<1x64x1xf32>,
    } else {
    }
    %c0 = arith.constant 0 : index
    %c0_1 = arith.constant 0 : index
    %3 = vector.load %arg3[%c0, %c0_1] : memref<64x3xf32, #tpu.memory_space<vmem>>, vector<64x3xf32>
    %4 = vector.extract_strided_slice %3 {offsets = [0, 0], sizes = [64, 1], strides = [1, 1]} : vector<64x3xf32> to vector<64x1xf32>
    %5 = vector.extract_strided_slice %3 {offsets = [0, 1], sizes = [64, 1], strides = [1, 1]} : vector<64x3xf32> to vector<64x1xf32>
    %6 = vector.extract_strided_slice %3 {offsets = [0, 2], sizes = [64, 1], strides = [1, 1]} : vector<64x3xf32> to vector<64x1xf32>
    %cst = arith.constant 0.000000e+00 : f32
    %7 = vector.broadcast %cst : f32 to vector<64x1xf32>
    %c0_2 = arith.constant 0 : index
    %c0_3 = arith.constant 0 : index
    %c0_4 = arith.constant 0 : index
    %8 = vector.load %arg2[%c0_2, %c0_3, %c0_4] : memref<1x3x128xf32, #tpu.memory_space<vmem>>, vector<1x3x128xf32>
    %9 = vector.shape_cast %8 : vector<1x3x128xf32> to vector<3x128xf32>
    %10 = vector.extract_strided_slice %9 {offsets = [0, 0], sizes = [1, 128], strides = [1, 1]} : vector<3x128xf32> to vector<1x128xf32>
    %11 = vector.broadcast %4 : vector<64x1xf32> to vector<64x128xf32>
    %12 = vector.broadcast %10 : vector<1x128xf32> to vector<64x128xf32>
    %13 = arith.mulf %11, %12 : vector<64x128xf32>
    %14 = vector.extract_strided_slice %9 {offsets = [1, 0], sizes = [1, 128], strides = [1, 1]} : vector<3x128xf32> to vector<1x128xf32>
    %15 = vector.broadcast %5 : vector<64x1xf32> to vector<64x128xf32>
    %16 = vector.broadcast %14 : vector<1x128xf32> to vector<64x128xf32>
    %17 = arith.mulf %15, %16 : vector<64x128xf32>
    %18 = arith.addf %13, %17 : vector<64x128xf32>
    %19 = vector.extract_strided_slice %9 {offsets = [2, 0], sizes = [1, 128], strides = [1, 1]} : vector<3x128xf32> to vector<1x128xf32>
    %20 = vector.broadcast %6 : vector<64x1xf32> to vector<64x128xf32>
    %21 = vector.broadcast %19 : vector<1x128xf32> to vector<64x128xf32>
    %22 = arith.mulf %20, %21 : vector<64x128xf32>
    %23 = arith.addf %18, %22 : vector<64x128xf32>
    %cst_5 = arith.constant 0.000000e+00 : f32
    %24 = vector.broadcast %cst_5 : f32 to vector<64x128xf32>
    %25 = arith.maximumf %23, %24 : vector<64x128xf32>
    %cst_6 = arith.constant dense<0.000000e+00> : vector<64xf32>
    %26 = vector.multi_reduction <add>, %25, %cst_6 [1] : vector<64x128xf32> to vector<64xf32>
    %27 = vector.shape_cast %26 : vector<64xf32> to vector<64x1xf32>
    %28 = arith.addf %7, %27 : vector<64x1xf32>
    %c0_7 = arith.constant 0 : index
    %c0_8 = arith.constant 0 : index
    %c0_9 = arith.constant 0 : index
    %29 = vector.load %arg4[%c0_7, %c0_8, %c0_9] : memref<1x64x1xf32, #tpu.memory_space<vmem>>, vector<1x64x1xf32>
    %30 = vector.shape_cast %29 : vector<1x64x1xf32> to vector<64x1xf32>
    %31 = arith.addf %30, %28 : vector<64x1xf32>
    %c0_10 = arith.constant 0 : index
    %c0_11 = arith.constant 0 : index
    %c0_12 = arith.constant 0 : index
    %32 = vector.load %arg4[%c0_10, %c0_11, %c0_12] : memref<1x64x1xf32, #tpu.memory_space<vmem>>, vector<1x64x1xf32>
    %33 = vector.shape_cast %32 : vector<1x64x1xf32> to vector<64x1xf32>
    %34 = vector.shape_cast %31 : vector<64x1xf32> to vector<1x64x1xf32>
    tpu.vector_store %arg4[%c0_10, %c0_11, %c0_12], %34 {strides = array<i32>} : memref<1x64x1xf32, #tpu.memory_space<vmem>>, vector<1x64x1xf32>,
    %c1_i32 = arith.constant 1 : i32
    %35 = arith.cmpi eq, %arg1, %c1_i32 : i32
    %36 = arith.extui %35 : i1 to i32
    %c0_i32_13 = arith.constant 0 : i32
    %37 = arith.cmpi ne, %36, %c0_i32_13 : i32
    scf.if %37 {
      %c0_14 = arith.constant 0 : index
      %c0_15 = arith.constant 0 : index
      %c0_16 = arith.constant 0 : index
      %38 = vector.load %arg4[%c0_14, %c0_15, %c0_16] : memref<1x64x1xf32, #tpu.memory_space<vmem>>, vector<1x64x1xf32>
      %cst_17 = arith.constant 3.906250e-03 : f32
      %39 = vector.broadcast %cst_17 : f32 to vector<1x64x1xf32>
      %40 = arith.mulf %38, %39 : vector<1x64x1xf32>
      %c0_18 = arith.constant 0 : index
      %c0_19 = arith.constant 0 : index
      %c0_20 = arith.constant 0 : index
      %41 = vector.load %arg4[%c0_18, %c0_19, %c0_20] : memref<1x64x1xf32, #tpu.memory_space<vmem>>, vector<1x64x1xf32>
      tpu.vector_store %arg4[%c0_18, %c0_19, %c0_20], %40 {strides = array<i32>} : memref<1x64x1xf32, #tpu.memory_space<vmem>>, vector<1x64x1xf32>,
    } else {
    }
    return
  }
  func.func @transform_0(%arg0: i32, %arg1: i32) -> (i32, i32, i32) {
    %c0_i32 = arith.constant 0 : i32
    %c0_i32_0 = arith.constant 0 : i32
    return %arg0, %c0_i32, %arg1 : i32, i32, i32
  }
  func.func @transform_1(%arg0: i32, %arg1: i32) -> (i32, i32) {
    %c0_i32 = arith.constant 0 : i32
    %c0_i32_0 = arith.constant 0 : i32
    %c0_i32_1 = arith.constant 0 : i32
    return %c0_i32, %c0_i32_0 : i32, i32
  }
  func.func @transform_2(%arg0: i32, %arg1: i32) -> (i32, i32, i32) {
    %c0_i32 = arith.constant 0 : i32
    %c0_i32_0 = arith.constant 0 : i32
    %c0_i32_1 = arith.constant 0 : i32
    return %arg0, %c0_i32, %c0_i32_0 : i32, i32, i32
  }
}

</mosaic_0001>

<bundles_post_ra>
// kernel: network_forward.1
= control target key start
LH: loop header
LB: loop body
LE: loop exit
PB: predicated region body
PF: predicated region fallthrough
CT: control target
= control target key end

     0   :  { %s625_s9 = smov 0   ;;  %s627_s10 = smov 0   ;;  %s770_s0 = inlined_call_operand.vmem [shape: f32[2,3,256], index: 0, kind: input, shape index: {}]   ;;  %s771_s1 = inlined_call_operand.vmem [shape: f32[64,3], index: 1, kind: input, shape index: {}]   ;;  %s772_s2 = inlined_call_operand.vmem [shape: f32[2,64,1], index: 2, kind: output, shape index: {}]  }
   0x1   :  { %s629_s11 = smov 0   ;;  %s631_s12 = smov 0  }
   0x2   :  { %s633_s13 = smov 0  }
   0x3 LB: > { %s21_s14 = sadd.s32 1, %s596_s11  ;;  %s24_s15 = sadd.s32 1, %s600_s12  ;;  %s604_s13 = sphi %s633_s13, %s12_s13   ;;  %s600_s12 = sphi %s631_s12, %s776_s12   ;;  %s596_s11 = sphi %s629_s11, %s775_s11   ;;  %s592_s10 = sphi %s627_s10, %s774_s10   ;;  %s588_s9 = sphi %s625_s9, %s773_s9  }
   0x4   : > { %p22_p0 = scmp.ge.s32.totalorder %s21_s14, 2  ;;  %p506_p1 = scmp.ge.s32.totalorder %s604_s13, 1 }
   0x5   : > { %p129_p2 = scmp.lt.s32.totalorder %s604_s13, 5 }
   0x6   : > { %s778_s14 = smov (%p22_p0, %s21_s14), 0  ;;  %s780_s15 = smov (!%p22_p0, %s24_s15), %s600_s12 }
   0x7   : > { %p130_p3 = pnand %p506_p1, %p129_p2  ;;  %p26_p4 = scmp.ge.s32.totalorder %s780_s15, 2 }
   0x8   : > { %p154_p5 = scmp.lt.s32.totalorder (!%p130_p3), %s592_s10, 1  ;;  %p156_p6 = scmp.lt.s32.totalorder (!%p130_p3), %s588_s9, 1 }
   0x9   : > { %s782_s15 = smov (%p26_p4, %s780_s15), 0  ;;  %133 = sbr.rel (%p130_p3) target bundleno = 365 (0x16d), region = 28 }
   0xa   : > { %p511_p7 = scmp.ne.s32.totalorder (!%p130_p3), %s588_s9, 0 }
  0x10   : > { %s784_s10 = smov (!%p154_p5, %s592_s10), 1  ;;  %170 = sbr.rel (%p511_p7) target bundleno = 24 (0x18), region = 32 }
  0x11   : > { %s157_s16 = scalar_select %p156_p6, %s588_s9, 1 }
  0x12   : > { %s507_s17 = sshll.u32 %s784_s10, 1  ;;  %s515_s18 = sshll.u32 %s784_s10, 6  ;;  %vm171_vm0 = vcmask (!%p511_p7), 7168   ;;  %v606_v0 = vmov (!%p511_p7), 0.0  }
  0x13   : > { %s159_s19 = sadd.s32 %s507_s17, %s157_s16  ;;  %s662_s22 = scalar_lea.vmem %s772_s2, %s515_s18 }
  0x14   : > { %s508_s23 = sshll.u32 %s159_s19, 2  ;;  %172 = vst.msk [vmem:[%s662_s22] sm:$0xff] (!%p511_p7), %vm171_vm0, %v606_v0  ;;  %173 = vst.msk [vmem:[%s662_s22 + $0x8] sm:$0xff] (!%p511_p7), %vm171_vm0, %v606_v0 }
  0x15   : > { %s667_s26 = scalar_lea.vmem %s770_s0, %s508_s23  ;;  %174 = vst.msk [vmem:[%s662_s22 + $0x10] sm:$0xff] (!%p511_p7), %vm171_vm0, %v606_v0  ;;  %175 = vst.msk [vmem:[%s662_s22 + $0x18] sm:$0xff] (!%p511_p7), %vm171_vm0, %v606_v0 }
  0x16   : > { %176 = vst.msk [vmem:[%s662_s22 + $0x20] sm:$0xff] (!%p511_p7), %vm171_vm0, %v606_v0  ;;  %177 = vst.msk [vmem:[%s662_s22 + $0x28] sm:$0xff] (!%p511_p7), %vm171_vm0, %v606_v0 }
  0x17   : > { %178 = vst.msk [vmem:[%s662_s22 + $0x30] sm:$0xff] %vm171_vm0, %v606_v0  ;;  %179 = vst.msk [vmem:[%s662_s22 + $0x38] sm:$0xff] %vm171_vm0, %v606_v0 }
  0x18 PF: > { %v182_v1 = vld [vmem:[%s771_s1 + $0x10] sm:$0xff]  ;;  %v180_v2 = vld [vmem:[%s771_s1] sm:$0xff]  ;;  %v607_v3 = vmov 0   ;;  %v183_v4 = vld [vmem:[%s771_s1 + $0x18] sm:$0xff]  ;;  %v608_v10 = vmov 1   ;;  %v609_v11 = vmov 2   ;;  %v229_v20 = vlaneseq }
  0x19   : > { %561 = vset.pattern.permute.xlu1 %v607_v3  ;;  %560 = vset.pattern.permute.xlu0 %v607_v3  ;;  %v181_v5 = vld [vmem:[%s771_s1 + $0x8] sm:$0xff]  ;;  %v184_v7 = vld [vmem:[%s771_s1 + $0x20] sm:$0xff]  ;;  %v187_v8 = vld [vmem:[%s771_s1 + $0x38] sm:$0xff]  ;;  %vm393_vm1 = vcmask 7168   ;;  %p512_p8 = scmp.ne.s32.totalorder %s588_s9, 1 }
  0x1a   : > { %201 = vperm.xlu1 %561, %v182_v1   ;;  %191 = vperm.xlu0 %560, %v180_v2   ;;  %v185_v6 = vld [vmem:[%s771_s1 + $0x28] sm:$0xff]  ;;  %v186_v9 = vld [vmem:[%s771_s1 + $0x30] sm:$0xff]  ;;  %v230_v23 = vshrl.u32 %v229_v20, 7  ;;  %v188_v29 = vld [vmem:[%s667_s26] sm:$0x7] }
  0x1c   : > { %v275_v26 = vsub.s32 1, %v230_v23  ;;  %v231_v30 = vsub.s32 0, %v230_v23  ;;  %v327_v32 = vsub.s32 2, %v230_v23 }
  0x1e   : > { %206 = vperm.xlu1 %561, %v183_v4   ;;  %196 = vperm.xlu0 %560, %v181_v5   ;;  %v276_v31 = vrot.slane %v188_v29, %v275_v26  ;;  %v232_v35 = vrot.slane %v188_v29, %v231_v30  ;;  %v328_v38 = vrot.slane %v188_v29, %v327_v32  ;;  %v378_v30 = vld [vmem:[%s662_s22 + $0x8] sm:$0xff] }
  0x22   : > { %216 = vperm.xlu1 %561, %v185_v6   ;;  %211 = vperm.xlu0 %560, %v184_v7  }
  0x26   : > { %226 = vperm.xlu1 %561, %v187_v8   ;;  %221 = vperm.xlu0 %560, %v186_v9  }
  0x2a   : > { %563 = vset.pattern.permute.xlu1 %v608_v10  ;;  %562 = vset.pattern.permute.xlu0 %v608_v10 }
  0x2b   : > { %246 = vperm.xlu1 %563, %v181_v5   ;;  %242 = vperm.xlu0 %562, %v180_v2  }
  0x2f   : > { %250 = vperm.xlu1 %563, %v182_v1   ;;  %254 = vperm.xlu0 %562, %v183_v4  }
  0x33   : > { %258 = vperm.xlu1 %563, %v184_v7   ;;  %262 = vperm.xlu0 %562, %v185_v6  }
  0x37   : > { %266 = vperm.xlu1 %563, %v186_v9   ;;  %270 = vperm.xlu0 %562, %v187_v8  }
  0x3b   : > { %564 = vset.pattern.permute.xlu1 %v609_v11  ;;  %565 = vset.pattern.permute.xlu0 %v609_v11 }
  0x3c   : > { %294 = vperm.xlu1 %564, %v180_v2   ;;  %298 = vperm.xlu0 %565, %v181_v5  }
  0x40   : > { %302 = vperm.xlu1 %564, %v182_v1   ;;  %310 = vperm.xlu0 %565, %v184_v7  }
  0x44   : > { %306 = vperm.xlu1 %564, %v183_v4   ;;  %318 = vperm.xlu0 %565, %v186_v9  }
  0x48   : > { %314 = vperm.xlu1 %564, %v185_v6  }
  0x4c   : > { %322 = vperm.xlu1 %564, %v187_v8  }
  0x99   : > { %v202_v12 = vpop.permute.xlu1 %201  ;;  %v192_v13 = vpop.permute.xlu0 %191 }
  0x9a   : > { %v233_v39 = vmul.f32 %v232_v35, %v192_v13  ;;  %v235_v49 = vmul.f32 %v232_v35, %v202_v12 }
  0x9d   : > { %v207_v14 = vpop.permute.xlu1 %206  ;;  %v197_v15 = vpop.permute.xlu0 %196 }
  0x9e   : > { %v234_v40 = vmul.f32 %v232_v35, %v197_v15  ;;  %v236_v63 = vmul.f32 %v232_v35, %v207_v14 }
  0xa1   : > { %v217_v16 = vpop.permute.xlu1 %216  ;;  %v212_v17 = vpop.permute.xlu0 %211 }
  0xa2   : > { %v237_v50 = vmul.f32 %v232_v35, %v212_v17  ;;  %v238_v12 = vmul.f32 %v232_v35, %v217_v16 }
  0xa5   : > { %v702_v18 = vpop.permute.xlu1 %226  ;;  %v222_v19 = vpop.permute.xlu0 %221 }
  0xa6   : > { %v239_v0 = vmul.f32 %v232_v35, %v222_v19  ;;  %v240_v23 = vmul.f32 %v232_v35, %v702_v18  ;;  %v381_v35 = vld [vmem:[%s662_s22 + $0x20] sm:$0xff] }
  0xaa   : > { %v247_v21 = vpop.permute.xlu1 %246  ;;  %v243_v22 = vpop.permute.xlu0 %242 }
  0xab   : > { %v278_v36 = vmul.f32 %v276_v31, %v247_v21  ;;  %v277_v37 = vmul.f32 %v276_v31, %v243_v22 }
  0xad   : > { %v286_v45 = vadd.f32 %v278_v36, %v234_v40  ;;  %v285_v46 = vadd.f32 %v277_v37, %v233_v39  ;;  %v379_v36 = vld [vmem:[%s662_s22 + $0x10] sm:$0xff] }
  0xae   : > { %v251_v24 = vpop.permute.xlu1 %250  ;;  %v255_v25 = vpop.permute.xlu0 %254 }
  0xaf   : > { %v279_v41 = vmul.f32 %v276_v31, %v251_v24  ;;  %v280_v54 = vmul.f32 %v276_v31, %v255_v25 }
  0xb1   : > { %v287_v53 = vadd.f32 %v279_v41, %v235_v49  ;;  %v288_v3 = vadd.f32 %v280_v54, %v236_v63  ;;  %v383_v41 = vld [vmem:[%s662_s22 + $0x30] sm:$0xff] }
  0xb2   : > { %v259_v27 = vpop.permute.xlu1 %258  ;;  %v263_v28 = vpop.permute.xlu0 %262 }
  0xb3   : > { %v281_v42 = vmul.f32 %v276_v31, %v259_v27  ;;  %v282_v4 = vmul.f32 %v276_v31, %v263_v28 }
  0xb5   : > { %v289_v55 = vadd.f32 %v281_v42, %v237_v50  ;;  %v290_v14 = vadd.f32 %v282_v4, %v238_v12  ;;  %v380_v42 = vld [vmem:[%s662_s22 + $0x18] sm:$0xff] }
  0xb6   : > { %v267_v33 = vpop.permute.xlu1 %266  ;;  %v271_v34 = vpop.permute.xlu0 %270  ;;  %v384_v50 = vld [vmem:[%s662_s22 + $0x38] sm:$0xff] }
  0xb7   : > { %v283_v56 = vmul.f32 %v276_v31, %v267_v33  ;;  %v284_v19 = vmul.f32 %v276_v31, %v271_v34  ;;  %v377_v31 = vld [vmem:[%s662_s22] sm:$0xff] }
  0xb9   : > { %v291_v5 = vadd.f32 %v283_v56, %v239_v0  ;;  %v292_v16 = vadd.f32 %v284_v19, %v240_v23 }
  0xbb   : > { %v295_v43 = vpop.permute.xlu1 %294  ;;  %v299_v44 = vpop.permute.xlu0 %298 }
  0xbc   : > { %v329_v47 = vmul.f32 %v328_v38, %v295_v43  ;;  %v330_v48 = vmul.f32 %v328_v38, %v299_v44 }
  0xbe   : > { %v337_v51 = vadd.f32 %v329_v47, %v285_v46  ;;  %v338_v52 = vadd.f32 %v330_v48, %v286_v45  ;;  %v382_v47 = vld [vmem:[%s662_s22 + $0x28] sm:$0xff] }
  0xbf   : > { %v303_v57 = vpop.permute.xlu1 %302  ;;  %v311_v58 = vpop.permute.xlu0 %310 }
  0xc0   : > { %v331_v59 = vmul.f32 %v328_v38, %v303_v57  ;;  %v333_v60 = vmul.f32 %v328_v38, %v311_v58  ;;  %v345_v61 = vmax.f32 %v337_v51, 0.0  ;;  %v346_v62 = vmax.f32 %v338_v52, 0.0 }
  0xc2   : > { %353 = vadd.xlane.f32.xlu0 %v345_v61  ;;  %355 = vadd.xlane.f32.xlu1 %v346_v62  ;;  %v339_v1 = vadd.f32 %v331_v59, %v287_v53  ;;  %v341_v2 = vadd.f32 %v333_v60, %v289_v55 }
  0xc3   : > { %v307_v6 = vpop.permute.xlu1 %306  ;;  %v319_v7 = vpop.permute.xlu0 %318 }
  0xc4   : > { %v332_v8 = vmul.f32 %v328_v38, %v307_v6  ;;  %v335_v9 = vmul.f32 %v328_v38, %v319_v7  ;;  %v347_v10 = vmax.f32 %v339_v1, 0.0  ;;  %v349_v11 = vmax.f32 %v341_v2, 0.0 }
  0xc6   : > { %357 = vadd.xlane.f32.xlu0 %v347_v10  ;;  %361 = vadd.xlane.f32.xlu1 %v349_v11  ;;  %v340_v13 = vadd.f32 %v332_v8, %v288_v3  ;;  %v343_v15 = vadd.f32 %v335_v9, %v291_v5 }
  0xc7   : > { %v315_v17 = vpop.permute.xlu1 %314 }
  0xc8   : > { %v334_v20 = vmul.f32 %v328_v38, %v315_v17  ;;  %v348_v21 = vmax.f32 %v340_v13, 0.0  ;;  %v351_v22 = vmax.f32 %v343_v15, 0.0 }
  0xca   : > { %359 = vadd.xlane.f32.xlu0 %v348_v21  ;;  %365 = vadd.xlane.f32.xlu1 %v351_v22  ;;  %v342_v24 = vadd.f32 %v334_v20, %v290_v14 }
  0xcb   : > { %v323_v25 = vpop.permute.xlu1 %322 }
  0xcc   : > { %v336_v26 = vmul.f32 %v328_v38, %v323_v25  ;;  %v350_v27 = vmax.f32 %v342_v24, 0.0 }
  0xce   : > { %363 = vadd.xlane.f32.xlu0 %v350_v27  ;;  %v344_v28 = vadd.f32 %v336_v26, %v292_v16 }
  0xd0   : > { %v352_v29 = vmax.f32 %v344_v28, 0.0 }
  0xd2   : > { %367 = vadd.xlane.f32.xlu0 %v352_v29 }
 0x14f   : > { %v356_v18 = vpop.xlane.xlu1 %355  ;;  %v354_v32 = vpop.xlane.xlu0 %353 }
 0x150   : > { %v386_v33 = vadd.f32 %v378_v30, %v356_v18  ;;  %v385_v34 = vadd.f32 %v377_v31, %v354_v32 }
 0x152   : > { %395 = vst.msk [vmem:[%s662_s22 + $0x8] sm:$0xff] %vm393_vm1, %v386_v33  ;;  %394 = vst.msk [vmem:[%s662_s22] sm:$0xff] %vm393_vm1, %v385_v34 }
 0x153   : > { %v362_v37 = vpop.xlane.xlu1 %361  ;;  %v358_v38 = vpop.xlane.xlu0 %357 }
 0x154   : > { %v389_v39 = vadd.f32 %v381_v35, %v362_v37  ;;  %v387_v40 = vadd.f32 %v379_v36, %v358_v38 }
 0x156   : > { %398 = vst.msk [vmem:[%s662_s22 + $0x20] sm:$0xff] %vm393_vm1, %v389_v39  ;;  %396 = vst.msk [vmem:[%s662_s22 + $0x10] sm:$0xff] %vm393_vm1, %v387_v40 }
 0x157   : > { %v366_v43 = vpop.xlane.xlu1 %365  ;;  %v360_v44 = vpop.xlane.xlu0 %359 }
 0x158   : > { %v391_v45 = vadd.f32 %v383_v41, %v366_v43  ;;  %v388_v46 = vadd.f32 %v380_v42, %v360_v44 }
 0x159   : > { %v406_v53 = vld [vmem:[%s662_s22] sm:$0xff] (!%p512_p8)  ;;  %v407_v54 = vld [vmem:[%s662_s22 + $0x8] sm:$0xff] (!%p512_p8) }
 0x15a   : > { %400 = vst.msk [vmem:[%s662_s22 + $0x30] sm:$0xff] %vm393_vm1, %v391_v45  ;;  %397 = vst.msk [vmem:[%s662_s22 + $0x18] sm:$0xff] %vm393_vm1, %v388_v46  ;;  %v414_v56 = vmul.f32 (!%p512_p8), 0.00390625, %v406_v53  ;;  %v415_v57 = vmul.f32 (!%p512_p8), 0.00390625, %v407_v54 }
 0x15b   : > { %v364_v48 = vpop.xlane.xlu0 %363 }
 0x15c   : > { %v390_v49 = vadd.f32 %v382_v47, %v364_v48  ;;  %405 = sbr.rel (%p512_p8) target bundleno = 365 (0x16d), region = 36  ;;  %422 = vst.msk [vmem:[%s662_s22] sm:$0xff] (!%p512_p8), %vm393_vm1, %v414_v56  ;;  %423 = vst.msk [vmem:[%s662_s22 + $0x8] sm:$0xff] (!%p512_p8), %vm393_vm1, %v415_v57 }
 0x15d   : > { %v408_v55 = vld [vmem:[%s662_s22 + $0x10] sm:$0xff] (!%p512_p8)  ;;  %v410_v60 = vld [vmem:[%s662_s22 + $0x20] sm:$0xff] (!%p512_p8) }
 0x15e   : > { %399 = vst.msk [vmem:[%s662_s22 + $0x28] sm:$0xff] %vm393_vm1, %v390_v49  ;;  %v416_v58 = vmul.f32 (!%p512_p8), 0.00390625, %v408_v55  ;;  %v418_v63 = vmul.f32 (!%p512_p8), 0.00390625, %v410_v60 }
 0x15f   : > { %v368_v51 = vpop.xlane.xlu0 %367 }
 0x160   : > { %v392_v52 = vadd.f32 %v384_v50, %v368_v51  ;;  %424 = vst.msk [vmem:[%s662_s22 + $0x10] sm:$0xff] (!%p512_p8), %vm393_vm1, %v416_v58  ;;  %426 = vst.msk [vmem:[%s662_s22 + $0x20] sm:$0xff] (!%p512_p8), %vm393_vm1, %v418_v63 }
 0x161   : > { %v409_v59 = vld [vmem:[%s662_s22 + $0x18] sm:$0xff] (!%p512_p8)  ;;  %v412_v1 = vld [vmem:[%s662_s22 + $0x30] sm:$0xff] (!%p512_p8) }
 0x162   : > { %401 = vst.msk [vmem:[%s662_s22 + $0x38] sm:$0xff] %vm393_vm1, %v392_v52  ;;  %v417_v62 = vmul.f32 (!%p512_p8), 0.00390625, %v409_v59  ;;  %v420_v3 = vmul.f32 (!%p512_p8), 0.00390625, %v412_v1 }
 0x164   : > { %425 = vst.msk [vmem:[%s662_s22 + $0x18] sm:$0xff] %vm393_vm1, %v417_v62  ;;  %428 = vst.msk [vmem:[%s662_s22 + $0x30] sm:$0xff] %vm393_vm1, %v420_v3 }
 0x165   : > { %v411_v61 = vld [vmem:[%s662_s22 + $0x28] sm:$0xff] }
 0x166   : > { %v419_v0 = vmul.f32 0.00390625, %v411_v61 }
 0x168   : > { %427 = vst.msk [vmem:[%s662_s22 + $0x28] sm:$0xff] %vm393_vm1, %v419_v0 }
 0x169   : > { %v413_v2 = vld [vmem:[%s662_s22 + $0x38] sm:$0xff] }
 0x16a   : > { %v421_v4 = vmul.f32 0.00390625, %v413_v2 }
 0x16c   : > { %429 = vst.msk [vmem:[%s662_s22 + $0x38] sm:$0xff] %vm393_vm1, %v421_v4 }
 0x16d PF: > { %s12_s13 = sadd.s32 1, %s604_s13   ;;  %s773_s9 = smov %s596_s11 }
 0x16e   : > { %p9_p9 = scmp.ge.s32.totalorder %s12_s13, 6   ;;  %s774_s10 = smov %s600_s12 }
 0x16f   : > { %s775_s11 = smov %s778_s14  ;;  %s776_s12 = smov %s782_s15 }
 0x170   :  { %11 = sbr.rel (!%p9_p9) target bundleno = 3 (0x3), region = 66 }

</bundles_post_ra>
